<compile_context>
chip_gen: v7x
topology: tpu7x:2x2x1
jax: 0.10.0
libtpu: 0.0.40
codegen_flags: <defaults>
</compile_context>

<pallas_src>
from functools import partial

import jax
import jax.numpy as jnp
from jax.experimental import pallas as pl
from jax.experimental.pallas import tpu as pltpu


_VMEM_LIMIT = 48 * 1024 * 1024   # explicit scoped-VMEM budget (v7x headroom)


# -----------------------------------------------------------------------------
# Tiling helper
# -----------------------------------------------------------------------------
def _tile(dim, pref, align):
    """Largest multiple of `align` that divides `dim` and is <= `pref`.

    If dim <= pref the full dim is used (always legal).  Only if no aligned
    divisor exists (pathological shapes) do we fall back to the full dim."""
    if dim <= pref:
        return dim
    t = (pref // align) * align
    while t >= align:
        if dim % t == 0:
            return t
        t -= align
    return dim


# -----------------------------------------------------------------------------
# Tiled linear kernels (f32 accumulator, bf16 MXU inputs)
# -----------------------------------------------------------------------------
def _linear_kernel(x_ref, w_ref, b_ref, o_ref, acc_ref, *, relu, compute_dtype):
    kk = pl.program_id(2)

    @pl.when(kk == 0)
    def _():
        acc_ref[...] = jnp.zeros_like(acc_ref)

    acc_ref[...] += jnp.dot(
        x_ref[...].astype(compute_dtype),
        w_ref[...].astype(compute_dtype),
        preferred_element_type=jnp.float32,
    )

    @pl.when(kk == pl.num_programs(2) - 1)
    def _():
        y = acc_ref[...] + b_ref[...]
        if relu:
            y = jnp.maximum(y, 0.0)
        o_ref[...] = y.astype(o_ref.dtype)


def _qk_proj_kernel(x_ref, w_ref, b_ref, o_ref, acc_ref, *, compute_dtype):
    # Fused Q|K projection: grid axis j in {0, 1} selects the Q or K weight
    # slab (w stored as (2, E, E)) and the matching output slab of the stacked
    # (2, N, E) output -> q/k never need wrapper-level slicing.
    kk = pl.program_id(2)

    @pl.when(kk == 0)
    def _():
        acc_ref[...] = jnp.zeros_like(acc_ref)

    acc_ref[...] += jnp.dot(
        x_ref[...].astype(compute_dtype),
        w_ref[0].astype(compute_dtype),
        preferred_element_type=jnp.float32,
    )

    @pl.when(kk == pl.num_programs(2) - 1)
    def _():
        o_ref[0] = (acc_ref[...] + b_ref[0]).astype(o_ref.dtype)


def _linear_add_ln_kernel(x_ref, w_ref, b_ref, r_ref, g_ref, be_ref,
                          o_ref, acc_ref, *, eps, compute_dtype):
    # out = LayerNorm(x @ w + b + residual)  (biased variance, like PyTorch)
    kk = pl.program_id(2)

    @pl.when(kk == 0)
    def _():
        acc_ref[...] = jnp.zeros_like(acc_ref)

    acc_ref[...] += jnp.dot(
        x_ref[...].astype(compute_dtype),
        w_ref[...].astype(compute_dtype),
        preferred_element_type=jnp.float32,
    )

    @pl.when(kk == pl.num_programs(2) - 1)
    def _():
        y = acc_ref[...] + b_ref[...] + r_ref[...]
        mu = jnp.mean(y, axis=-1, keepdims=True)
        var = jnp.mean(jnp.square(y - mu), axis=-1, keepdims=True)
        o_ref[...] = (
            (y - mu) * jax.lax.rsqrt(var + eps) * g_ref[...] + be_ref[...]
        ).astype(o_ref.dtype)


def linear(x, w, b, *, relu=False, compute_dtype=jnp.bfloat16,
           tm=512, tn=1024, tk=512):
    """x: (N, K) @ w: (K, M) + b: (1, M) -> (N, M); tiled, K-accumulated."""
    N, K = x.shape
    M = w.shape[1]
    tm, tn, tk = _tile(N, tm, 8), _tile(M, tn, 128), _tile(K, tk, 128)
    grid = (N // tm, M // tn, K // tk)
    return pl.pallas_call(
        partial(_linear_kernel, relu=relu, compute_dtype=compute_dtype),
        out_shape=jax.ShapeDtypeStruct((N, M), x.dtype),
        grid=grid,
        in_specs=[
            pl.BlockSpec((tm, tk), lambda i, j, k: (i, k)),
            pl.BlockSpec((tk, tn), lambda i, j, k: (k, j)),
            pl.BlockSpec((1, tn), lambda i, j, k: (0, j)),
        ],
        out_specs=pl.BlockSpec((tm, tn), lambda i, j, k: (i, j)),
        scratch_shapes=[pltpu.VMEM((tm, tn), jnp.float32)],
        compiler_params=pltpu.CompilerParams(
            dimension_semantics=("parallel", "parallel", "arbitrary"),
            vmem_limit_bytes=_VMEM_LIMIT),
        cost_estimate=pl.CostEstimate(
            flops=2 * N * K * M, transcendentals=0,
            bytes_accessed=4 * N * K + 2 * K * M + 4 * N * M),
    )(x, w, b)


def qk_projection(x, w_qk, b_qk, *, compute_dtype=jnp.bfloat16,
                  tm=512, tk=512):
    """x: (N, K); w_qk: (2, K, E) stacked [Wq, Wk]; b_qk: (2, 1, E).
    Returns (2, N, E) stacked [q, k] written directly by the out_spec."""
    N, K = x.shape
    E = w_qk.shape[2]
    tm, tk = _tile(N, tm, 8), _tile(K, tk, 128)
    grid = (N // tm, 2, K // tk)
    return pl.pallas_call(
        partial(_qk_proj_kernel, compute_dtype=compute_dtype),
        out_shape=jax.ShapeDtypeStruct((2, N, E), x.dtype),
        grid=grid,
        in_specs=[
            pl.BlockSpec((tm, tk), lambda i, j, k: (i, k)),
            pl.BlockSpec((1, tk, E), lambda i, j, k: (j, k, 0)),
            pl.BlockSpec((1, 1, E), lambda i, j, k: (j, 0, 0)),
        ],
        out_specs=pl.BlockSpec((1, tm, E), lambda i, j, k: (j, i, 0)),
        scratch_shapes=[pltpu.VMEM((tm, E), jnp.float32)],
        compiler_params=pltpu.CompilerParams(
            dimension_semantics=("parallel", "parallel", "arbitrary"),
            vmem_limit_bytes=_VMEM_LIMIT),
        cost_estimate=pl.CostEstimate(
            flops=2 * N * K * (2 * E), transcendentals=0,
            bytes_accessed=4 * N * K + 2 * 2 * K * E + 4 * 2 * N * E),
    )(x, w_qk, b_qk)


def linear_add_layernorm(x, w, b, res, gamma, beta, *, eps=1e-5,
                         compute_dtype=jnp.bfloat16, tm=512, tk=512):
    """LayerNorm((x @ w + b) + res), LN fused into the matmul epilogue.

    The output (M = emb_dim) stays un-tiled so the LN feature reduction lives
    inside a single block."""
    N, K = x.shape
    M = w.shape[1]
    tm, tk = _tile(N, tm, 8), _tile(K, tk, 128)
    grid = (N // tm, 1, K // tk)
    return pl.pallas_call(
        partial(_linear_add_ln_kernel, eps=eps, compute_dtype=compute_dtype),
        out_shape=jax.ShapeDtypeStruct((N, M), x.dtype),
        grid=grid,
        in_specs=[
            pl.BlockSpec((tm, tk), lambda i, j, k: (i, k)),
            pl.BlockSpec((tk, M), lambda i, j, k: (k, 0)),
            pl.BlockSpec((1, M), lambda i, j, k: (0, 0)),
            pl.BlockSpec((tm, M), lambda i, j, k: (i, 0)),
            pl.BlockSpec((1, M), lambda i, j, k: (0, 0)),
            pl.BlockSpec((1, M), lambda i, j, k: (0, 0)),
        ],
        out_specs=pl.BlockSpec((tm, M), lambda i, j, k: (i, 0)),
        scratch_shapes=[pltpu.VMEM((tm, M), jnp.float32)],
        compiler_params=pltpu.CompilerParams(
            dimension_semantics=("parallel", "parallel", "arbitrary"),
            vmem_limit_bytes=_VMEM_LIMIT),
        cost_estimate=pl.CostEstimate(
            flops=2 * N * K * M, transcendentals=0,
            bytes_accessed=4 * N * K + 2 * K * M + 2 * 4 * N * M),
    )(x, w, b, res, gamma, beta)


# -----------------------------------------------------------------------------
# Multi-head attention: flash-style, grid = (batch, q-tiles, kv-tiles)
# -----------------------------------------------------------------------------
def _mha_kernel(q_ref, k_ref, v_ref, o_ref, m_scr, l_scr, acc_scr,
                *, nhead, scale, compute_dtype):
    kv = pl.program_id(2)

    @pl.when(kv == 0)
    def _():
        m_scr[...] = jnp.full(m_scr.shape, -jnp.inf, dtype=m_scr.dtype)
        l_scr[...] = jnp.zeros_like(l_scr)
        acc_scr[...] = jnp.zeros_like(acc_scr)

    E = q_ref.shape[-1]
    dh = E // nhead
    tq = q_ref.shape[-2]

    q = q_ref[0, 0].astype(jnp.float32) * scale     # (tq, E)
    k = k_ref[0, 0]                                  # (tkv, E)
    v = v_ref[0]                                     # (tkv, E)

    # Static unroll over heads: per-head (tq, tkv) score/prob tensors are
    # consumed into the scratch accumulators immediately, bounding live ranges.
    for h in range(nhead):
        lo = h * dh
        qh = q[:, lo:lo + dh].astype(compute_dtype)
        kh = k[:, lo:lo + dh].astype(compute_dtype)
        vh = v[:, lo:lo + dh].astype(compute_dtype)
        s = jax.lax.dot_general(                     # (tq, tkv) = qh @ kh^T
            qh, kh, (((1,), (1,)), ((), ())),
            preferred_element_type=jnp.float32)
        m_prev = m_scr[h]                            # (tq, 1)
        m_new = jnp.maximum(m_prev, jnp.max(s, axis=-1, keepdims=True))
        alpha = jnp.exp(m_prev - m_new)
        p = jnp.exp(s - m_new)
        l_scr[h] = alpha * l_scr[h] + jnp.sum(p, axis=-1, keepdims=True)
        acc_scr[:, lo:lo + dh] = alpha * acc_scr[:, lo:lo + dh] + jnp.dot(
            p.astype(compute_dtype), vh, preferred_element_type=jnp.float32)
        m_scr[h] = m_new

    @pl.when(kv == pl.num_programs(2) - 1)
    def _():
        # Build a full-width (tq, E) inverse so the o store is lane-dense.
        inv = jnp.concatenate(
            [jnp.broadcast_to(pl.reciprocal(l_scr[h], approx=True), (tq, dh))
             for h in range(nhead)], axis=-1)
        o_ref[0] = (acc_scr[...] * inv).astype(o_ref.dtype)


def attention(qk, v, *, nhead, scale, compute_dtype=jnp.bfloat16,
              tq=256, tkv=512):
    """qk: (2, B, S, E) stacked [q, k]; v: (B, S, E) -> (B, S, E)."""
    _, B, S, E = qk.shape
    tq = _tile(S, tq, 8)
    tkv = _tile(S, tkv, 8)
    grid = (B, S // tq, S // tkv)
    q_spec = pl.BlockSpec((1, 1, tq, E), lambda b, qi, kv: (0, b, qi, 0))
    k_spec = pl.BlockSpec((1, 1, tkv, E), lambda b, qi, kv: (1, b, kv, 0))
    v_spec = pl.BlockSpec((1, tkv, E), lambda b, qi, kv: (b, kv, 0))
    o_spec = pl.BlockSpec((1, tq, E), lambda b, qi, kv: (b, qi, 0))
    return pl.pallas_call(
        partial(_mha_kernel, nhead=nhead, scale=scale,
                compute_dtype=compute_dtype),
        out_shape=jax.ShapeDtypeStruct((B, S, E), v.dtype),
        grid=grid,
        in_specs=[q_spec, k_spec, v_spec],
        out_specs=o_spec,
        scratch_shapes=[
            pltpu.VMEM((nhead, tq, 1), jnp.float32),   # running max  m
            pltpu.VMEM((nhead, tq, 1), jnp.float32),   # running sum  l
            pltpu.VMEM((tq, E), jnp.float32),          # output accumulator
        ],
        compiler_params=pltpu.CompilerParams(
            dimension_semantics=("parallel", "parallel", "arbitrary"),
            vmem_limit_bytes=_VMEM_LIMIT),
        cost_estimate=pl.CostEstimate(
            flops=4 * B * S * S * E,
            transcendentals=B * nhead * S * S,
            bytes_accessed=4 * 4 * B * S * E),
    )(qk, qk, v)


# -----------------------------------------------------------------------------
# T_E_Layer forward (eval mode: all dropouts are identity)
# -----------------------------------------------------------------------------
def t_e_layer_forward(x, params, pos=None, *, compute_dtype=jnp.bfloat16):
    # x: (S, B, E) — PyTorch nn.MultiheadAttention seq-first convention.
    S, B, E = x.shape
    H = params["nhead"]
    dh = E // H
    scale = 1.0 / float(dh) ** 0.5

    # Single layout change to batch-major tokens (B, S, E); undone at the end.
    xb = jnp.transpose(x, (1, 0, 2))
    qb = xb if pos is None else xb + jnp.transpose(pos, (1, 0, 2))

    x_tok = xb.reshape(B * S, E)
    q_tok = qb.reshape(B * S, E)

    # In-projections: fused Q|K matmul emits a stacked (2, N, E) array whose
    # q/k slabs are consumed directly by the attention BlockSpecs; V separate.
    qk = qk_projection(q_tok, params["w_qk"], params["b_qk"],
                       compute_dtype=compute_dtype)          # (2, N, E)
    v = linear(x_tok, params["w_v"], params["b_v"],
               compute_dtype=compute_dtype)                  # (N, E)

    attn = attention(qk.reshape(2, B, S, E), v.reshape(B, S, E),
                     nhead=H, scale=scale,
                     compute_dtype=compute_dtype).reshape(B * S, E)

    # Out-projection with fused residual-add + LayerNorm1 (dropout1 == id).
    x1 = linear_add_layernorm(attn, params["w_o"], params["b_o"],
                              x_tok, params["ln1_g"], params["ln1_b"],
                              compute_dtype=compute_dtype)

    # FFN: linear1 + ReLU, then linear2 fused with residual-add + LayerNorm2.
    h = linear(x1, params["w_1"], params["b_1"], relu=True,
               compute_dtype=compute_dtype)
    out = linear_add_layernorm(h, params["w_2"], params["b_2"],
                               x1, params["ln2_g"], params["ln2_b"],
                               compute_dtype=compute_dtype)

    return jnp.transpose(out.reshape(B, S, E), (1, 0, 2))


# -----------------------------------------------------------------------------
# Deterministic parameter init + demo
# -----------------------------------------------------------------------------
def make_params(key, emb_dim, nhead, dim_forward, param_dtype=jnp.bfloat16):
    """Weights (MXU operands) are stored in `param_dtype` (bf16: native MXU
    dtype + half the weight DMA bytes).  Biases and LayerNorm params stay f32
    because they are consumed by the f32 epilogues."""
    ks = jax.random.split(key, 6)
    std = 0.02

    def w(k, shp):
        return (std * jax.random.normal(k, shp)).astype(param_dtype)

    return {
        "nhead": nhead,
        # attention in-projections; Q|K stacked as (2, E, E), pre-transposed
        "w_qk": jnp.stack([w(ks[0], (emb_dim, emb_dim)),
                           w(ks[1], (emb_dim, emb_dim))], axis=0),
        "b_qk": jnp.zeros((2, 1, emb_dim), jnp.float32),
        "w_v": w(ks[2], (emb_dim, emb_dim)),
        "b_v": jnp.zeros((1, emb_dim), jnp.float32),
        # attention out-projection
        "w_o": w(ks[3], (emb_dim, emb_dim)),
        "b_o": jnp.zeros((1, emb_dim), jnp.float32),
        # feed-forward
        "w_1": w(ks[4], (emb_dim, dim_forward)),
        "b_1": jnp.zeros((1, dim_forward), jnp.float32),
        "w_2": w(ks[5], (dim_forward, emb_dim)),
        "b_2": jnp.zeros((1, emb_dim), jnp.float32),
        # layer norms
        "ln1_g": jnp.ones((1, emb_dim), jnp.float32),
        "ln1_b": jnp.zeros((1, emb_dim), jnp.float32),
        "ln2_g": jnp.ones((1, emb_dim), jnp.float32),
        "ln2_b": jnp.zeros((1, emb_dim), jnp.float32),
    }


if __name__ == "__main__":
    S, B, E, H, F = 8, 2, 32, 4, 64   # seq, batch, emb_dim, nhead, dim_forward

    key = jax.random.PRNGKey(0)
    k_x, k_pos, k_p = jax.random.split(key, 3)

    x = jax.random.normal(k_x, (S, B, E), dtype=jnp.float32)
    pos = jax.random.normal(k_pos, (S, B, E), dtype=jnp.float32)
    params = make_params(k_p, E, H, F, param_dtype=jnp.bfloat16)

    out = t_e_layer_forward(x, params, pos=pos, compute_dtype=jnp.bfloat16)
    out = jax.block_until_ready(out)
    assert out.shape == (S, B, E) and out.dtype == jnp.float32
    print("KERNEL_OK")
</pallas_src>

<mosaic_0001>
module attributes {stable_mosaic.version = 11 : i64} {
  func.func @_qk_proj_kernel(%arg0: i32, %arg1: i32, %arg2: i32, %arg3: memref<16x32xf32, #tpu.memory_space<vmem>>, %arg4: memref<1x32x32xbf16, #tpu.memory_space<vmem>>, %arg5: memref<1x1x32xf32, #tpu.memory_space<vmem>>, %arg6: memref<1x16x32xf32, #tpu.memory_space<vmem>>, %arg7: memref<16x32xf32, #tpu.memory_space<vmem>>) attributes {dimension_semantics = [#tpu.dimension_semantics<parallel>, #tpu.dimension_semantics<parallel>, #tpu.dimension_semantics<arbitrary>], iteration_bounds = array<i64: 1, 2, 1>, scalar_prefetch = 0 : i64, scratch_operands = 1 : i64, tpu.core_type = #tpu.core_type<tc>, window_params = [{transform_indices = @transform_0, window_bounds = array<i64: 16, 32>}, {transform_indices = @transform_1, window_bounds = array<i64: 1, 32, 32>}, {transform_indices = @transform_2, window_bounds = array<i64: 1, 1, 32>}, {transform_indices = @transform_3, window_bounds = array<i64: 1, 16, 32>}]} {
    %c0_i32 = arith.constant 0 : i32
    %0 = arith.cmpi eq, %arg2, %c0_i32 : i32
    %1 = arith.extui %0 : i1 to i32
    %c0_i32_0 = arith.constant 0 : i32
    %2 = arith.cmpi ne, %1, %c0_i32_0 : i32
    scf.if %2 {
      %cst_11 = arith.constant 0.000000e+00 : f32
      %14 = vector.broadcast %cst_11 : f32 to vector<16x32xf32>
      %c0_12 = arith.constant 0 : index
      %c0_13 = arith.constant 0 : index
      %15 = vector.load %arg7[%c0_12, %c0_13] : memref<16x32xf32, #tpu.memory_space<vmem>>, vector<16x32xf32>
      tpu.vector_store %arg7[%c0_12, %c0_13], %14 {strides = array<i32>} : memref<16x32xf32, #tpu.memory_space<vmem>>, vector<16x32xf32>,
    } else {
    }
    %c0 = arith.constant 0 : index
    %c0_1 = arith.constant 0 : index
    %3 = vector.load %arg7[%c0, %c0_1] : memref<16x32xf32, #tpu.memory_space<vmem>>, vector<16x32xf32>
    %c0_2 = arith.constant 0 : index
    %c0_3 = arith.constant 0 : index
    %4 = vector.load %arg3[%c0_2, %c0_3] : memref<16x32xf32, #tpu.memory_space<vmem>>, vector<16x32xf32>
    %5 = arith.truncf %4 : vector<16x32xf32> to vector<16x32xbf16>
    %c0_4 = arith.constant 0 : index
    %c0_5 = arith.constant 0 : index
    %c0_6 = arith.constant 0 : index
    %6 = vector.load %arg4[%c0_4, %c0_5, %c0_6] : memref<1x32x32xbf16, #tpu.memory_space<vmem>>, vector<1x32x32xbf16>
    %7 = vector.shape_cast %6 : vector<1x32x32xbf16> to vector<32x32xbf16>
    %cst = arith.constant dense<0.000000e+00> : vector<16x32xf32>
    %8 = tpu.matmul %5, %7, %cst {dimension_numbers = #tpu.dot_dimension_numbers<[1], [0], [0], [1], [0, 0, 1, 1], [], []>} : vector<16x32xbf16>, vector<32x32xbf16>, vector<16x32xf32> -> vector<16x32xf32>
    %9 = arith.addf %3, %8 : vector<16x32xf32>
    %c0_7 = arith.constant 0 : index
    %c0_8 = arith.constant 0 : index
    %10 = vector.load %arg7[%c0_7, %c0_8] : memref<16x32xf32, #tpu.memory_space<vmem>>, vector<16x32xf32>
    tpu.vector_store %arg7[%c0_7, %c0_8], %9 {strides = array<i32>} : memref<16x32xf32, #tpu.memory_space<vmem>>, vector<16x32xf32>,
    %c0_i32_9 = arith.constant 0 : i32
    %11 = arith.cmpi eq, %arg2, %c0_i32_9 : i32
    %12 = arith.extui %11 : i1 to i32
    %c0_i32_10 = arith.constant 0 : i32
    %13 = arith.cmpi ne, %12, %c0_i32_10 : i32
    scf.if %13 {
      %c0_11 = arith.constant 0 : index
      %c0_12 = arith.constant 0 : index
      %14 = vector.load %arg7[%c0_11, %c0_12] : memref<16x32xf32, #tpu.memory_space<vmem>>, vector<16x32xf32>
      %c0_13 = arith.constant 0 : index
      %c0_14 = arith.constant 0 : index
      %c0_15 = arith.constant 0 : index
      %15 = vector.load %arg5[%c0_13, %c0_14, %c0_15] : memref<1x1x32xf32, #tpu.memory_space<vmem>>, vector<1x1x32xf32>
      %16 = vector.shape_cast %15 : vector<1x1x32xf32> to vector<1x32xf32>
      %17 = vector.broadcast %16 : vector<1x32xf32> to vector<16x32xf32>
      %18 = arith.addf %14, %17 : vector<16x32xf32>
      %c0_16 = arith.constant 0 : index
      %c0_17 = arith.constant 0 : index
      %c0_18 = arith.constant 0 : index
      %19 = vector.load %arg6[%c0_16, %c0_17, %c0_18] : memref<1x16x32xf32, #tpu.memory_space<vmem>>, vector<1x16x32xf32>
      %20 = vector.shape_cast %19 : vector<1x16x32xf32> to vector<16x32xf32>
      %21 = vector.shape_cast %18 : vector<16x32xf32> to vector<1x16x32xf32>
      tpu.vector_store %arg6[%c0_16, %c0_17, %c0_18], %21 {strides = array<i32>} : memref<1x16x32xf32, #tpu.memory_space<vmem>>, vector<1x16x32xf32>,
    } else {
    }
    return
  }
  func.func @transform_0(%arg0: i32, %arg1: i32, %arg2: i32) -> (i32, i32) {
    %c0_i32 = arith.constant 0 : i32
    return %arg0, %arg2 : i32, i32
  }
  func.func @transform_1(%arg0: i32, %arg1: i32, %arg2: i32) -> (i32, i32, i32) {
    %c0_i32 = arith.constant 0 : i32
    %c0_i32_0 = arith.constant 0 : i32
    return %arg1, %arg2, %c0_i32 : i32, i32, i32
  }
  func.func @transform_2(%arg0: i32, %arg1: i32, %arg2: i32) -> (i32, i32, i32) {
    %c0_i32 = arith.constant 0 : i32
    %c0_i32_0 = arith.constant 0 : i32
    %c0_i32_1 = arith.constant 0 : i32
    return %arg1, %c0_i32, %c0_i32_0 : i32, i32, i32
  }
  func.func @transform_3(%arg0: i32, %arg1: i32, %arg2: i32) -> (i32, i32, i32) {
    %c0_i32 = arith.constant 0 : i32
    %c0_i32_0 = arith.constant 0 : i32
    return %arg1, %arg0, %c0_i32 : i32, i32, i32
  }
}

</mosaic_0001>

<bundles_post_ra>
// kernel: tpu_custom_call.1
= control target key start
LH: loop header
LB: loop body
LE: loop exit
PB: predicated region body
PF: predicated region fallthrough
CT: control target
= control target key end

     0   :  { %8 = vsyncpa [#allocation4], 0  ;;  %s1011_s0 = inlined_call_operand.hbm [shape: f32[16,32], index: 0, kind: input, shape index: {}]   ;;  %s1012_s1 = inlined_call_operand.hbm [shape: bf16[2,32,32], index: 1, kind: input, shape index: {}]   ;;  %s1013_s2 = inlined_call_operand.vmem [shape: f32[2,1,32], index: 2, kind: input, shape index: {}]   ;;  %s1014_s3 = inlined_call_operand.hbm [shape: f32[2,16,32], index: 3, kind: output, shape index: {}]  }
   0x1   :  { %9 = vsyncpa [#allocation7], 0 }
   0x2   :  { %11 = vsyncpa [#allocation7 + $0x1], 0 }
   0x3   :  { %12 = vsyncpa [#allocation5], 0 }
   0x4   :  { %14 = vsyncpa [#allocation5 + $0x1], 0  ;;  %s776_s12 = smov 0   ;;  %s778_s13 = smov 0  }
   0x5   :  { %s780_s14 = smov 0   ;;  %s782_s15 = smov 0  }
   0x6   :  { %s784_s16 = smov 0   ;;  %s786_s17 = smov 0  }
   0x7 LB: > { %s482_s18 = sadd.s32 4294967295, %s743_s17   ;;  %s483_s19 = sadd.s32 4294967294, %s743_s17   ;;  %s743_s17 = sphi %s786_s17, %s20_s17   ;;  %s739_s16 = sphi %s784_s16, %s1038_s16   ;;  %s735_s15 = sphi %s782_s15, %s1037_s15   ;;  %s731_s14 = sphi %s780_s14, %s1036_s14   ;;  %s727_s13 = sphi %s778_s13, %s1035_s13   ;;  %s723_s12 = sphi %s776_s12, %s1034_s12  }
   0x8   : > { %p89_p0 = scmp.ne.s32.totalorder %s727_s13, %s723_s12  ;;  %p810_p1 = scmp.eq.s32.totalorder %s482_s18, 0 }
   0x9   : > { %p814_p2 = scmp.eq.s32.totalorder %s482_s18, 1  ;;  %p147_p3 = scmp.eq.s32.totalorder %s483_s19, 1 }
   0xa   : > { %s1019_s20 = scalar_select %p810_p1, 1, 0 }
   0xb   : > { %s1020_s21 = scalar_select %p814_p2, 1, 0 }
   0xc   : > { %p820_p4 = por %p810_p1, %p89_p0  ;;  %p484_p5 = scmp.ge.s32.totalorder %s743_s17, 1 }
   0xd   : > { %p825_p6 = por %p147_p3, %p89_p0  ;;  %p154_p7 = scmp.lt.s32.totalorder %s743_s17, 3 }
   0xe   : > { %s1021_s22 = scalar_select %p820_p4, 1, 0 }
   0xf   : > { %s1022_s23 = scalar_select %p825_p6, 1, 0 }
  0x10   : > { %p830_p8 = pnand %p484_p5, %p154_p7  ;;  %s745_s25 = smov [#allocation3]  }
  0x11   : > { %s170_s26 = sshll.u32 %s745_s25, 4  ;;  %s35_s28 = sadd.s32 1, %s739_s16  ;;  %s171_s26 = int_to_ptr.vmem [resolvable:$true] %s170_s26 }
  0x12   : > { %s1023_s24 = scalar_select %p830_p8, 1, 0 }
  0x13   : > { %p524_p9 = pneg %p830_p8  ;;  %s599_s4 = scalar_lea.hbm %s1011_s0, 256 }
  0x14   : > { %p600_p12 = scmp.ne.s32.totalorder %s1011_s0, %s599_s4  ;;  %p606_p5 = scmp.lt.u32.totalorder %s599_s4, %s1011_s0 }
  0x15   : > { %p839_p11 = pnand %p524_p9, %p810_p1 }
  0x17   : > { %p601_p13 = pneg %p839_p11 }
  0x19   : > { %p602_p0 = pnand %p601_p13, %p600_p12 }
  0x1b   : > { %p603_p3 = pneg %p602_p0 }
  0x1d   : > { %p608_p7 = pnand %p606_p5, %p603_p3 }
  0x1f   : > { %611 = shalt.err (!%p608_p7)
}
  0x20   : > { %s612_s9 = scalar_lea.vmem %s171_s26, 256  ;;  %p620_p4 = scmp.lt.s32.totalorder %s171_s26, %s171_s26 }
  0x21   : > { %p613_p9 = scmp.ne.s32.totalorder %s171_s26, %s612_s9  ;;  %p621_p1 = scmp.lt.s32.totalorder %s612_s9, %s612_s9 }
  0x23   : > { %p615_p10 = pnand %p613_p9, %p601_p13  ;;  %p622_p8 = por %p621_p1, %p620_p4 }
  0x25   : > { %p616_p6 = pneg %p615_p10 }
  0x27   : > { %p623_p2 = pnand %p622_p8, %p616_p6 }
  0x29   : > { %626 = shalt.err (!%p623_p2)
}
  0x2a   : > { %s746_s10 = smov 128   ;;  %s747_s11 = smov 8  }
  0x2b   : > { %527 = dma.hbm_to_vmem [thread:$0]  (!%p839_p11), %s1011_s0, 256, %s171_s26, [#allocation4], %s746_s10, %s746_s10, %s747_s11  }
  0x2c   : > { %p37_p1 = scmp.ge.s32.totalorder %s35_s28, 2  ;;  %s76_s25 = sadd.s32 1, %s731_s14 }
  0x2d   : > { %p83_p2 = scmp.ne.s32.totalorder %s731_s14, %s727_s13  ;;  %p84_p4 = scmp.eq.s32.totalorder %s743_s17, 0 }
  0x2e   : > { %s1040_s28 = smov (%p37_p1, %s35_s28), 0  ;;  %p1026_p8 = scmp.ne.s32.totalorder %s1020_s21, 0 }
  0x2f   : > { %p866_p6 = por %p84_p4, %p83_p2  ;;  %s71_s27 = ssub.s32 %s739_s16, %s1040_s28 }
  0x30   : > { %p872_p10 = por %p1026_p8, %p83_p2  ;;  %p537_p12 = scmp.lt.s32.totalorder %s743_s17, 2 }
  0x31   : > { %p74_p11 = scmp.eq.s32.totalorder %s71_s27, 0  ;;  %s184_s26 = sand.u32 1, %s731_s14  }
  0x32   : > { %s487_s4 = sshll.u32 %s184_s26, 4  ;;  %s503_s6 = sshll.u32 %s739_s16, 8 }
  0x33   : > { %s881_s5 = scalar_select %p74_p11, %s731_s14, %s76_s25  }
  0x34   : > { %s887_s9 = scalar_lea.hbm %s1012_s1, %s503_s6  ;;  %s188_s21 = scalar_lea.vmem [#allocation6], %s487_s4 }
  0x35   : > { %s197_s10 = sshll.u32 %s188_s21, 4  ;;  %p893_p13 = pnand %p537_p12, %p866_p6  ;;  %s889_s10 = int_to_ptr.vmem [resolvable:$true] %s197_s10 }
  0x36   : > { %s897_s18 = scalar_lea.sflag [#allocation7], %s184_s26  ;;  %s627_s19 = scalar_lea.hbm %s887_s9, 256 }
  0x37   : > { %p628_p0 = scmp.ne.s32.totalorder %s887_s9, %s627_s19  ;;  %p629_p3 = pneg %p893_p13 }
  0x38   : > { %s632_s29 = scalar_lea.hbm %s1012_s1, 512  ;;  %p633_p9 = scmp.lt.u32.totalorder %s887_s9, %s1012_s1 }
  0x39   : > { %p630_p5 = pnand %p629_p3, %p628_p0  ;;  %p634_p1 = scmp.lt.u32.totalorder %s632_s29, %s627_s19 }
  0x3a   : > { %p636_p4 = scmp.lt.u32.totalorder %s627_s19, %s887_s9 }
  0x3b   : > { %p631_p7 = pneg %p630_p5  ;;  %p635_p2 = por %p634_p1, %p633_p9 }
  0x3d   : > { %p637_p6 = por %p636_p4, %p635_p2 }
  0x3f   : > { %p638_p8 = pnand %p637_p6, %p631_p7 }
  0x41   : > { %641 = shalt.err (!%p638_p8)
}
  0x42   : > { %s642_s26 = scalar_lea.vmem %s889_s10, 256  ;;  %s748_s7 = smov [#allocation6]  }
  0x43   : > { %p643_p12 = scmp.ne.s32.totalorder %s889_s10, %s642_s26  ;;  %s647_s8 = sshll.u32 %s748_s7, 4  ;;  %s648_s8 = int_to_ptr.vmem [resolvable:$false] %s647_s8 }
  0x44   : > { %s649_s21 = scalar_lea.vmem %s648_s8, 512  ;;  %p650_p5 = scmp.lt.s32.totalorder %s889_s10, %s648_s8 }
  0x45   : > { %p645_p11 = pnand %p643_p12, %p629_p3  ;;  %p651_p9 = scmp.lt.s32.totalorder %s649_s21, %s642_s26 }
  0x47   : > { %p646_p0 = pneg %p645_p11  ;;  %p652_p1 = por %p651_p9, %p650_p5 }
  0x49   : > { %p653_p2 = pnand %p652_p1, %p646_p0 }
  0x4b   : > { %656 = shalt.err (!%p653_p2)
}
  0x4c   : > { %s749_s19 = smov 64   ;;  %s750_s25 = smov 4  }
  0x4d   : > { %531 = dma.hbm_to_vmem [thread:$0]  (!%p893_p13), %s887_s9, 256, %s889_s10, %s897_s18, %s749_s19, %s749_s19, %s750_s25  }
  0x4e   : > { %p1029_p3 = scmp.ne.s32.totalorder %s1023_s24, 0 }
  0x4f   : > { %p1030_p7 = scmp.ne.s32.totalorder (!%p1029_p3), %s1019_s20, 0 }
  0x50   : > { %215 = sbr.rel (%p1029_p3) target bundleno = 342 (0x156), region = 32 }
  0x57   : > { %710 = dma.done.wait (%p1030_p7), [#allocation4], 256  }
  0x58   : > { %712 = vsyncadd (%p1030_p7), [#allocation4], 4294967040  ;;  %s932_s27 = sand.u32 1, %s727_s13   ;;  %p1031_p13 = scmp.ne.s32.totalorder %s1021_s22, 0 }
  0x59   : > { %s492_s29 = sshll.u32 %s932_s27, 4  ;;  %s222_s4 = scalar_lea.sflag [#allocation7], %s932_s27 }
  0x5a   : > { %s225_s9 = scalar_lea.vmem [#allocation6], %s492_s29 }
  0x5b   : > { %714 = dma.done.wait (%p1031_p13), %s222_s4, 256  }
  0x5c   : > { %716 = vsyncadd (%p1031_p13), %s222_s4, 4294967040  ;;  %vm262_vm0 = vcmask 261120   ;;  %v751_v0 = vmov 0.0   ;;  %vm752_vm1 = vmmov 0   ;;  %v597_v1 = vld [vmem:[%s225_s9] sm:$0xff]   ;;  %v598_v2 = vld [vmem:[%s225_s9 + $0x8] sm:$0xff]  }
  0x5d   : > { %508 = vmatprep.subr.bf16.mxu0 %v751_v0  ;;  %512 = vmatprep.mubr.msk.bf16.mxu0 %vm752_vm1, %v751_v0  ;;  %263 = vst.msk [vmem:[#allocation2] sm:$0xff] %vm262_vm0, %v751_v0  ;;  %264 = vst.msk [vmem:[#allocation2 + $0x8] sm:$0xff] %vm262_vm0, %v751_v0  ;;  %v267_v3 = vld [vmem:[#allocation3] sm:$0xff]  ;;  %v268_v4 = vld [vmem:[#allocation3 + $0x8] sm:$0xff]  ;;  %p253_p4 = scmp.lt.s32.totalorder %s735_s15, 1  ;;  %s504_s11 = sshll.u32 %s735_s15, 8 }
  0x5e   : > { %509 = vmatpush3.bf16.msra.mxu0 %v597_v1  ;;  %v269_v5 = vpack.c.bf16 %v268_v4, %v267_v3  ;;  %s250_s18 = scalar_lea.vmem [#allocation8], %s492_s29  ;;  %s958_s8 = scalar_lea.hbm %s1014_s3, %s504_s11 }
  0x5f   : > { %510 = vmatprep.subr.bf16.mxu0 %v751_v0  ;;  %s254_s20 = scalar_select %p253_p4, %s735_s15, 1 }
  0x60   : > { %s367_s6 = sshll.u32 %s250_s18, 4  ;;  %s352_s15 = scalar_lea.sflag [#allocation5], %s932_s27  ;;  %s960_s6 = int_to_ptr.vmem [resolvable:$true] %s367_s6 }
  0x61   : > { %s255_s10 = scalar_lea.vmem %s1013_s2, %s254_s20  ;;  %s657_s21 = scalar_lea.vmem %s960_s6, 256 }
  0x62   : > { %511 = vmatpush3.bf16.msra.mxu0 %v598_v2  ;;  %v497_v14 = vld [vmem:[%s255_s10] ss:$0 sm:$0xff]  ;;  %p658_p6 = scmp.ne.s32.totalorder %s960_s6, %s657_s21  ;;  %s753_s19 = smov [#allocation8]  }
  0x63   : > { %s661_s25 = sshll.u32 %s753_s19, 4  ;;  %s662_s25 = int_to_ptr.vmem [resolvable:$false] %s661_s25 }
  0x64   : > { %v265_v6 = vld [vmem:[#allocation2] sm:$0xff]  ;;  %v266_v8 = vld [vmem:[#allocation2 + $0x8] sm:$0xff]  ;;  %p659_p8 = pnand %p658_p6, %p872_p10  ;;  %s663_s29 = scalar_lea.vmem %s662_s25, 512 }
  0x65   : > { %513 = vmatmul.mubr.msk.bf16.vlgmr.msra.gmra.mrb[0].mxu0 %vm262_vm0, %v269_v5  ;;  %p664_p11 = scmp.lt.s32.totalorder %s960_s6, %s662_s25  ;;  %p665_p0 = scmp.lt.s32.totalorder %s663_s29, %s657_s21 }
  0x66   : > { %p660_p12 = pneg %p659_p8 }
  0x67   : > { %p666_p5 = por %p665_p0, %p664_p11 }
  0x69   : > { %p667_p9 = pnand %p666_p5, %p660_p12 }
 0x138   : > { %v324_v7 = vpop.f32.mrb[0].mxu0 }
 0x139   : > { %v331_v9 = vadd.f32 %v324_v7, %v265_v6  ;;  %v514_v10 = vpop.f32.mrb[1].mxu0 }
 0x13a   : > { %v327_v11 = vpop.f32.mrb[2].mxu0 }
 0x13b   : > { %333 = vst.msk [vmem:[#allocation2] sm:$0xff] %vm262_vm0, %v331_v9  ;;  %v332_v12 = vadd.f32 %v327_v11, %v266_v8  ;;  %v515_v13 = vpop.f32.mrb[3].mxu0 }
 0x13d   : > { %334 = vst.msk [vmem:[#allocation2 + $0x8] sm:$0xff] %vm262_vm0, %v332_v12 }
 0x142   : > { %v338_v15 = vld [vmem:[#allocation2] sm:$0xff] }
 0x143   : > { %v347_v16 = vadd.f32 %v497_v14, %v338_v15 }
 0x144   : > { %v339_v17 = vld [vmem:[#allocation2 + $0x8] sm:$0xff] }
 0x145   : > { %v348_v18 = vadd.f32 %v497_v14, %v339_v17  ;;  %349 = vst.msk [vmem:[%s250_s18] sm:$0xff] %vm262_vm0, %v347_v16 }
 0x147   : > { %350 = vst.msk [vmem:[%s250_s18 + $0x8] sm:$0xff] %vm262_vm0, %v348_v18 }
 0x148   : > { %670 = shalt.err (!%p667_p9)
}
 0x149   : > { %s671_s4 = scalar_lea.hbm %s958_s8, 256  ;;  %s675_s22 = scalar_lea.hbm %s1014_s3, 512 }
 0x14a   : > { %p672_p1 = scmp.ne.s32.totalorder %s958_s8, %s671_s4  ;;  %p676_p7 = scmp.lt.u32.totalorder %s958_s8, %s1014_s3 }
 0x14b   : > { %p677_p13 = scmp.lt.u32.totalorder %s675_s22, %s671_s4  ;;  %p679_p6 = scmp.lt.u32.totalorder %s671_s4, %s958_s8 }
 0x14c   : > { %p673_p2 = pnand %p672_p1, %p872_p10 }
 0x14d   : > { %p678_p4 = por %p677_p13, %p676_p7 }
 0x14e   : > { %p674_p3 = pneg %p673_p2 }
 0x14f   : > { %p680_p8 = por %p679_p6, %p678_p4 }
 0x151   : > { %p681_p12 = pnand %p680_p8, %p674_p3 }
 0x153   : > { %684 = shalt.err (!%p681_p12)
}
 0x154   : > { %s754_s11 = smov 128   ;;  %s755_s18 = smov 8  }
 0x155   : > { %522 = dma.vmem_to_hbm [thread:$0]  (%p872_p10), %s960_s6, 256, %s958_s8, %s352_s15, %s754_s11, %s754_s11, %s755_s18  }
 0x156 PF: > { %s382_s26 = sand.u32 1, %s723_s12   ;;  %p1032_p11 = scmp.ne.s32.totalorder %s1022_s23, 0 }
 0x157   : > { %p1033_p0 = scmp.ge.s32.totalorder %s743_s17, 2  ;;  %s383_s7 = scalar_lea.sflag [#allocation5], %s382_s26 }
 0x159   : > { %p533_p5 = pnand %p1033_p0, %p1032_p11 }
 0x15b   : > { %718 = dma.done.wait (!%p533_p5), %s383_s7, 256  }
 0x15c   : > { %720 = vsyncadd (!%p533_p5), %s383_s7, 4294967040  ;;  %s20_s17 = sadd.s32 1, %s743_s17   ;;  %s1034_s12 = smov %s727_s13 }
 0x15d   : > { %p17_p9 = scmp.ge.s32.totalorder %s20_s17, 4   ;;  %s1035_s13 = smov %s731_s14 }
 0x15e   : > { %s1036_s14 = smov %s881_s5  ;;  %s1037_s15 = smov %s739_s16 }
 0x15f   : > { %s1038_s16 = smov %s1040_s28  ;;  %19 = sbr.rel (!%p17_p9) target bundleno = 7 (0x7), region = 94 }
 0x166   :  { %388 = vsyncpa [#allocation4], 1 }
 0x167   :  { %390 = vsyncpa [#allocation4 + $0x1], 1 }
 0x168   :  { %391 = vsyncpa [#allocation7], 1 }
 0x169   :  { %393 = vsyncpa [#allocation7 + $0x1], 1 }
 0x16a   :  { %394 = vsyncpa [#allocation5], 1 }
 0x16b   :  { %396 = vsyncpa [#allocation5 + $0x1], 1 }

</bundles_post_ra>
